<compile_context>
chip_gen: v7x
topology: tpu7x:2x2x1
jax: 0.10.0
libtpu: 0.0.40
codegen_flags: <defaults>
</compile_context>

<pallas_src>
import functools

import jax
import jax.numpy as jnp
from jax.experimental import pallas as pl
from jax.experimental.pallas import tpu as pltpu


_FP32_MIN_NORMAL = 1.1754944e-38


def _round_up(n, m):
    return ((n + m - 1) // m) * m


def _ensemble_kernel(x_ref, w_ref, b_ref, o_ref, *, mt, cp, num_models,
                     single_model):
    """One grid step: one wide matmul for mt models, then per-model softmax-add."""
    blk = pl.program_id(1)                     # model-block index (innermost, reduction)

    # Trans.apply(x, seed) -> identity (see TODO in header).
    x = x_ref[...]                             # (tb, Dp) bf16, pre-cast in wrapper
    w = w_ref[0]                               # (Dp, mt*Cp) bf16
    b = b_ref[0]                               # (1,  mt*Cp) f32; -1e30 in padded cols

    # Single wide MXU matmul covering all mt models of this block, f32 accumulate.
    logits = jnp.dot(x, w, preferred_element_type=jnp.float32) + b   # (tb, mt*Cp)

    tail = num_models % mt                     # valid models in the last block (0 => full)

    def softmax_slice(j):
        lg = logits[:, j * cp:(j + 1) * cp]    # static, 128-aligned lane slice
        mx = jnp.max(lg, axis=-1, keepdims=True)
        e = jnp.exp(lg - mx)
        return e / jnp.sum(e, axis=-1, keepdims=True)   # exact divide (VPU slack)

    for j in range(mt):
        if j == 0:
            # Model 0 of every block is always valid.  The first block writes
            # the output block directly (no zero-init pass); later blocks add.
            probs = softmax_slice(0)

            @pl.when(blk == 0)
            def _():
                o_ref[...] = probs

            @pl.when(blk != 0)
            def _():
                o_ref[...] += probs
        elif tail != 0 and j >= tail:
            # Only the last block can contain padded models: skip their
            # softmax + accumulate entirely.
            @pl.when(blk * mt + j < num_models)
            def _(j=j):
                o_ref[...] += softmax_slice(j)
        else:
            o_ref[...] += softmax_slice(j)

    if not single_model:
        @pl.when(blk == pl.num_programs(1) - 1)
        def _():
            avg = o_ref[...] * jnp.float32(1.0 / num_models)
            # torch.clamp(min=1e-40) + log; floor raised to FLT_MIN (see header).
            o_ref[...] = jnp.log(jnp.maximum(avg, jnp.float32(_FP32_MIN_NORMAL)))


def pack_ensemble_params(weights, biases, mt):
    """Pad/cast once (hoist out of the hot path) and pack mt models along lanes.

    weights: [M, D, C] -> [nblk, Dp, mt*Cp] bf16
    biases:  [M, C]    -> [nblk, 1,  mt*Cp] f32 (padded classes/models = -1e30)
    """
    M, D, C = weights.shape
    Dp = _round_up(D, 128)
    Cp = _round_up(C, 128)
    nblk = pl.cdiv(M, mt)
    Mp = nblk * mt

    w_p = (jnp.zeros((Mp, Dp, Cp), jnp.bfloat16)
           .at[:M, :D, :C].set(weights.astype(jnp.bfloat16)))
    b_p = (jnp.full((Mp, Cp), -1e30, jnp.float32)
           .at[:M, :C].set(biases.astype(jnp.float32)))

    # Model j of block blk occupies lane columns [j*Cp, (j+1)*Cp).
    w_packed = (w_p.reshape(nblk, mt, Dp, Cp)
                .transpose(0, 2, 1, 3)
                .reshape(nblk, Dp, mt * Cp))
    b_packed = b_p.reshape(nblk, 1, mt * Cp)
    return w_packed, b_packed


def ensemble_logits_prepacked(x, w_packed, b_packed, *, num_models, mt,
                              n_classes, tb=None):
    """x: [B, D]; packed params from pack_ensemble_params -> [B, n_classes] f32."""
    B, D = x.shape
    nblk, Dp, mtCp = w_packed.shape
    Cp = mtCp // mt
    assert mt * Cp == mtCp and Dp >= D and n_classes <= Cp
    assert b_packed.shape == (nblk, 1, mtCp)

    # Batch tiling: one resident batch block streams the full weight tensor
    # exactly once (arithmetic intensity w.r.t. weights == tb), so use the
    # largest tile that comfortably fits VMEM.  Tunable via `tb`.
    if tb is None:
        tb = _round_up(B, 8) if B <= 512 else 512
    tb = max(8, _round_up(min(tb, _round_up(B, 8)), 8))
    Bp = _round_up(B, tb)
    nb = Bp // tb

    # Pad batch/feature dims and pre-cast activations to bf16 once.
    x_p = (jnp.zeros((Bp, Dp), jnp.bfloat16)
           .at[:B, :D].set(x.astype(jnp.bfloat16)))

    kernel = functools.partial(
        _ensemble_kernel, mt=mt, cp=Cp, num_models=num_models,
        single_model=(num_models == 1))

    out_p = pl.pallas_call(
        kernel,
        out_shape=jax.ShapeDtypeStruct((Bp, Cp), jnp.float32),
        grid_spec=pltpu.PrefetchScalarGridSpec(
            num_scalar_prefetch=0,
            grid=(nb, nblk),
            in_specs=[
                pl.BlockSpec((tb, Dp), lambda bi, mb: (bi, 0)),           # x
                pl.BlockSpec((1, Dp, mtCp), lambda bi, mb: (mb, 0, 0)),   # packed W
                pl.BlockSpec((1, 1, mtCp), lambda bi, mb: (mb, 0, 0)),    # packed b
            ],
            out_specs=pl.BlockSpec((tb, Cp), lambda bi, mb: (bi, 0)),     # acc / out
        ),
        compiler_params=pltpu.CompilerParams(
            # batch axis parallel (megacore), model axis is the reduction.
            dimension_semantics=("parallel", "arbitrary"),
            vmem_limit_bytes=32 * 1024 * 1024,
        ),
    )(x_p, w_packed, b_packed)

    return out_p[:B, :n_classes]


def ensemble_logits(x, weights, biases, *, mt=None, tb=None):
    """x: [B, D] f32; weights: [M, D, C]; biases: [M, C] -> [B, C] f32."""
    B, D = x.shape
    M, Dw, C = weights.shape
    assert Dw == D and biases.shape == (M, C)
    assert M > 0

    Dp = _round_up(D, 128)
    Cp = _round_up(C, 128)

    if mt is None:
        # Keep the double-buffered bf16 weight block under ~8 MiB (fits the
        # v7x 32 MiB scoped budget with headroom) and the packed lane width
        # modest so the logits temp stays small.
        budget = 8 * 1024 * 1024
        mt = max(1, budget // (4 * Dp * Cp))
        mt = int(min(mt, M, max(1, 2048 // Cp)))
    mt = max(1, min(int(mt), M))

    # NOTE: for repeated calls with fixed parameters, call pack_ensemble_params
    # once and use ensemble_logits_prepacked to keep the pad/cast off the hot path.
    w_packed, b_packed = pack_ensemble_params(weights, biases, mt)
    return ensemble_logits_prepacked(
        x, w_packed, b_packed, num_models=M, mt=mt, n_classes=C, tb=tb)


def _reference(x, weights, biases):
    """Pure-JAX f32 reference matching the PyTorch forward semantics."""
    M = weights.shape[0]
    outs = 0.0
    for m in range(M):
        logits = x @ weights[m] + biases[m]
        outs = outs + jax.nn.softmax(logits, axis=-1)
    if M > 1:
        avg = outs / M
        return jnp.log(jnp.maximum(avg, 1e-40))
    return outs


if __name__ == "__main__":
    # Small deterministic problem: batch=8, hidden=32, classes=16, 3 models.
    B, D, C, M = 8, 32, 16, 3

    key = jax.random.PRNGKey(0)
    kx, kw, kb = jax.random.split(key, 3)
    x = jax.random.normal(kx, (B, D), dtype=jnp.float32)
    weights = 0.1 * jax.random.normal(kw, (M, D, C), dtype=jnp.float32)
    biases = 0.05 * jax.random.normal(kb, (M, C), dtype=jnp.float32)

    # mt=2 -> two model-blocks: exercises cross-grid accumulation into the
    # output block plus skipping of the padded 4th model slot.
    out = jax.block_until_ready(ensemble_logits(x, weights, biases, mt=2))

    ref = _reference(x, weights, biases)
    assert out.shape == (B, C)
    err = float(jnp.max(jnp.abs(out - ref)))
    # Tolerance vs the pure-f32 reference: the kernel runs the matmuls in bf16
    # on the MXU (documented precision tradeoff); the softmax divide is exact,
    # so the remaining error is bf16 rounding of x / W only.
    assert err < 3e-2, f"max abs err {err}"

    print("KERNEL_OK")
</pallas_src>

<mosaic_0001>
module attributes {stable_mosaic.version = 11 : i64} {
  func.func @_ensemble_kernel(%arg0: i32, %arg1: i32, %arg2: memref<8x128xbf16, #tpu.memory_space<vmem>>, %arg3: memref<1x128x256xbf16, #tpu.memory_space<vmem>>, %arg4: memref<1x1x256xf32, #tpu.memory_space<vmem>>, %arg5: memref<8x128xf32, #tpu.memory_space<vmem>>) attributes {dimension_semantics = [#tpu.dimension_semantics<parallel>, #tpu.dimension_semantics<arbitrary>], iteration_bounds = array<i64: 1, 2>, scalar_prefetch = 0 : i64, scratch_operands = 0 : i64, tpu.core_type = #tpu.core_type<tc>, window_params = [{transform_indices = @transform_0, window_bounds = array<i64: 8, 128>}, {transform_indices = @transform_1, window_bounds = array<i64: 1, 128, 256>}, {transform_indices = @transform_2, window_bounds = array<i64: 1, 1, 256>}, {transform_indices = @transform_3, window_bounds = array<i64: 8, 128>}]} {
    %c0 = arith.constant 0 : index
    %c0_0 = arith.constant 0 : index
    %0 = vector.load %arg2[%c0, %c0_0] : memref<8x128xbf16, #tpu.memory_space<vmem>>, vector<8x128xbf16>
    %c0_1 = arith.constant 0 : index
    %c0_2 = arith.constant 0 : index
    %c0_3 = arith.constant 0 : index
    %1 = vector.load %arg3[%c0_1, %c0_2, %c0_3] : memref<1x128x256xbf16, #tpu.memory_space<vmem>>, vector<1x128x256xbf16>
    %2 = vector.shape_cast %1 : vector<1x128x256xbf16> to vector<128x256xbf16>
    %c0_4 = arith.constant 0 : index
    %c0_5 = arith.constant 0 : index
    %c0_6 = arith.constant 0 : index
    %3 = vector.load %arg4[%c0_4, %c0_5, %c0_6] : memref<1x1x256xf32, #tpu.memory_space<vmem>>, vector<1x1x256xf32>
    %4 = vector.shape_cast %3 : vector<1x1x256xf32> to vector<1x256xf32>
    %cst = arith.constant dense<0.000000e+00> : vector<8x256xf32>
    %5 = tpu.matmul %0, %2, %cst {dimension_numbers = #tpu.dot_dimension_numbers<[1], [0], [0], [1], [0, 0, 1, 1], [], []>} : vector<8x128xbf16>, vector<128x256xbf16>, vector<8x256xf32> -> vector<8x256xf32>
    %6 = vector.broadcast %4 : vector<1x256xf32> to vector<8x256xf32>
    %7 = arith.addf %5, %6 : vector<8x256xf32>
    %8 = vector.extract_strided_slice %7 {offsets = [0, 0], sizes = [8, 128], strides = [1, 1]} : vector<8x256xf32> to vector<8x128xf32>
    %cst_7 = arith.constant dense<0xFF800000> : vector<8xf32>
    %9 = vector.multi_reduction <maximumf>, %8, %cst_7 [1] : vector<8x128xf32> to vector<8xf32>
    %10 = vector.shape_cast %9 : vector<8xf32> to vector<8x1xf32>
    %11 = vector.broadcast %10 : vector<8x1xf32> to vector<8x128xf32>
    %12 = arith.subf %8, %11 : vector<8x128xf32>
    %13 = math.exp %12 : vector<8x128xf32>
    %cst_8 = arith.constant dense<0.000000e+00> : vector<8xf32>
    %14 = vector.multi_reduction <add>, %13, %cst_8 [1] : vector<8x128xf32> to vector<8xf32>
    %15 = vector.shape_cast %14 : vector<8xf32> to vector<8x1xf32>
    %16 = vector.broadcast %15 : vector<8x1xf32> to vector<8x128xf32>
    %17 = arith.divf %13, %16 : vector<8x128xf32>
    %c0_i32 = arith.constant 0 : i32
    %18 = arith.cmpi eq, %arg1, %c0_i32 : i32
    %19 = arith.extui %18 : i1 to i32
    %c0_i32_9 = arith.constant 0 : i32
    %20 = arith.cmpi ne, %19, %c0_i32_9 : i32
    scf.if %20 {
      %c0_15 = arith.constant 0 : index
      %c0_16 = arith.constant 0 : index
      %32 = vector.load %arg5[%c0_15, %c0_16] : memref<8x128xf32, #tpu.memory_space<vmem>>, vector<8x128xf32>
      tpu.vector_store %arg5[%c0_15, %c0_16], %17 {strides = array<i32>} : memref<8x128xf32, #tpu.memory_space<vmem>>, vector<8x128xf32>,
    } else {
    }
    %c0_i32_10 = arith.constant 0 : i32
    %21 = arith.cmpi ne, %arg1, %c0_i32_10 : i32
    %22 = arith.extui %21 : i1 to i32
    %c0_i32_11 = arith.constant 0 : i32
    %23 = arith.cmpi ne, %22, %c0_i32_11 : i32
    scf.if %23 {
      %c0_15 = arith.constant 0 : index
      %c0_16 = arith.constant 0 : index
      %32 = vector.load %arg5[%c0_15, %c0_16] : memref<8x128xf32, #tpu.memory_space<vmem>>, vector<8x128xf32>
      %33 = arith.addf %32, %17 : vector<8x128xf32>
      %c0_17 = arith.constant 0 : index
      %c0_18 = arith.constant 0 : index
      %34 = vector.load %arg5[%c0_17, %c0_18] : memref<8x128xf32, #tpu.memory_space<vmem>>, vector<8x128xf32>
      tpu.vector_store %arg5[%c0_17, %c0_18], %33 {strides = array<i32>} : memref<8x128xf32, #tpu.memory_space<vmem>>, vector<8x128xf32>,
    } else {
    }
    %c2_i32 = arith.constant 2 : i32
    %24 = arith.muli %arg1, %c2_i32 : i32
    %c1_i32 = arith.constant 1 : i32
    %25 = arith.addi %24, %c1_i32 : i32
    %c3_i32 = arith.constant 3 : i32
    %26 = arith.cmpi slt, %25, %c3_i32 : i32
    %27 = arith.extui %26 : i1 to i32
    %c0_i32_12 = arith.constant 0 : i32
    %28 = arith.cmpi ne, %27, %c0_i32_12 : i32
    scf.if %28 {
      %c0_15 = arith.constant 0 : index
      %c0_16 = arith.constant 0 : index
      %32 = vector.load %arg5[%c0_15, %c0_16] : memref<8x128xf32, #tpu.memory_space<vmem>>, vector<8x128xf32>
      %33 = vector.extract_strided_slice %7 {offsets = [0, 128], sizes = [8, 128], strides = [1, 1]} : vector<8x256xf32> to vector<8x128xf32>
      %cst_17 = arith.constant dense<0xFF800000> : vector<8xf32>
      %34 = vector.multi_reduction <maximumf>, %33, %cst_17 [1] : vector<8x128xf32> to vector<8xf32>
      %35 = vector.shape_cast %34 : vector<8xf32> to vector<8x1xf32>
      %36 = vector.broadcast %35 : vector<8x1xf32> to vector<8x128xf32>
      %37 = arith.subf %33, %36 : vector<8x128xf32>
      %38 = math.exp %37 : vector<8x128xf32>
      %cst_18 = arith.constant dense<0.000000e+00> : vector<8xf32>
      %39 = vector.multi_reduction <add>, %38, %cst_18 [1] : vector<8x128xf32> to vector<8xf32>
      %40 = vector.shape_cast %39 : vector<8xf32> to vector<8x1xf32>
      %41 = vector.broadcast %40 : vector<8x1xf32> to vector<8x128xf32>
      %42 = arith.divf %38, %41 : vector<8x128xf32>
      %43 = arith.addf %32, %42 : vector<8x128xf32>
      %c0_19 = arith.constant 0 : index
      %c0_20 = arith.constant 0 : index
      %44 = vector.load %arg5[%c0_19, %c0_20] : memref<8x128xf32, #tpu.memory_space<vmem>>, vector<8x128xf32>
      tpu.vector_store %arg5[%c0_19, %c0_20], %43 {strides = array<i32>} : memref<8x128xf32, #tpu.memory_space<vmem>>, vector<8x128xf32>,
    } else {
    }
    %c1_i32_13 = arith.constant 1 : i32
    %29 = arith.cmpi eq, %arg1, %c1_i32_13 : i32
    %30 = arith.extui %29 : i1 to i32
    %c0_i32_14 = arith.constant 0 : i32
    %31 = arith.cmpi ne, %30, %c0_i32_14 : i32
    scf.if %31 {
      %c0_15 = arith.constant 0 : index
      %c0_16 = arith.constant 0 : index
      %32 = vector.load %arg5[%c0_15, %c0_16] : memref<8x128xf32, #tpu.memory_space<vmem>>, vector<8x128xf32>
      %cst_17 = arith.constant 0.333333343 : f32
      %33 = vector.broadcast %cst_17 : f32 to vector<8x128xf32>
      %34 = arith.mulf %32, %33 : vector<8x128xf32>
      %cst_18 = arith.constant 1.17549435E-38 : f32
      %35 = vector.broadcast %cst_18 : f32 to vector<8x128xf32>
      %36 = arith.maximumf %34, %35 : vector<8x128xf32>
      %37 = math.log %36 : vector<8x128xf32>
      %c0_19 = arith.constant 0 : index
      %c0_20 = arith.constant 0 : index
      %38 = vector.load %arg5[%c0_19, %c0_20] : memref<8x128xf32, #tpu.memory_space<vmem>>, vector<8x128xf32>
      tpu.vector_store %arg5[%c0_19, %c0_20], %37 {strides = array<i32>} : memref<8x128xf32, #tpu.memory_space<vmem>>, vector<8x128xf32>,
    } else {
    }
    return
  }
  func.func @transform_0(%arg0: i32, %arg1: i32) -> (i32, i32) {
    %c0_i32 = arith.constant 0 : i32
    %c0_i32_0 = arith.constant 0 : i32
    return %arg0, %c0_i32 : i32, i32
  }
  func.func @transform_1(%arg0: i32, %arg1: i32) -> (i32, i32, i32) {
    %c0_i32 = arith.constant 0 : i32
    %c0_i32_0 = arith.constant 0 : i32
    %c0_i32_1 = arith.constant 0 : i32
    return %arg1, %c0_i32, %c0_i32_0 : i32, i32, i32
  }
  func.func @transform_2(%arg0: i32, %arg1: i32) -> (i32, i32, i32) {
    %c0_i32 = arith.constant 0 : i32
    %c0_i32_0 = arith.constant 0 : i32
    %c0_i32_1 = arith.constant 0 : i32
    return %arg1, %c0_i32, %c0_i32_0 : i32, i32, i32
  }
  func.func @transform_3(%arg0: i32, %arg1: i32) -> (i32, i32) {
    %c0_i32 = arith.constant 0 : i32
    %c0_i32_0 = arith.constant 0 : i32
    return %arg0, %c0_i32 : i32, i32
  }
}

</mosaic_0001>

<bundles_post_ra>
// kernel: tpu_custom_call.1
= control target key start
LH: loop header
LB: loop body
LE: loop exit
PB: predicated region body
PF: predicated region fallthrough
CT: control target
= control target key end

     0   :  { %8 = vsyncpa [#allocation3], 0  ;;  %s1066_s0 = inlined_call_operand.hbm [shape: bf16[8,128], index: 0, kind: input, shape index: {}]   ;;  %s1067_s1 = inlined_call_operand.hbm [shape: bf16[2,128,256], index: 1, kind: input, shape index: {}]   ;;  %s1068_s2 = inlined_call_operand.vmem [shape: f32[2,1,256], index: 2, kind: input, shape index: {}]   ;;  %s1069_s3 = inlined_call_operand.hbm [shape: f32[8,128], index: 3, kind: output, shape index: {}]  }
   0x1   :  { %9 = vsyncpa [#allocation6], 0 }
   0x2   :  { %11 = vsyncpa [#allocation6 + $0x1], 0 }
   0x3   :  { %12 = vsyncpa [#allocation4], 0  ;;  %s844_s12 = smov 0   ;;  %s846_s13 = smov 0  }
   0x4   :  { %s848_s14 = smov 0   ;;  %s850_s15 = smov 0  }
   0x5   :  { %s852_s16 = smov 0   ;;  %s854_s17 = smov 0  }
   0x6 LB: > { %s527_s18 = sadd.s32 4294967295, %s816_s17   ;;  %s63_s19 = sadd.s32 1, %s804_s14  ;;  %s816_s17 = sphi %s854_s17, %s18_s17   ;;  %s812_s16 = sphi %s852_s16, %s1090_s16   ;;  %s808_s15 = sphi %s850_s15, %s1089_s15   ;;  %s804_s14 = sphi %s848_s14, %s1088_s14   ;;  %s800_s13 = sphi %s846_s13, %s1087_s13   ;;  %s796_s12 = sphi %s844_s12, %s1086_s12  }
   0x7   : > { %p70_p0 = scmp.ne.s32.totalorder %s804_s14, %s800_s13  ;;  %p71_p1 = scmp.eq.s32.totalorder %s816_s17, 0 }
   0x8   : > { %p76_p2 = scmp.ne.s32.totalorder %s800_s13, %s796_s12  ;;  %p880_p3 = scmp.eq.s32.totalorder %s527_s18, 0 }
   0x9   : > { %p72_p4 = por %p71_p1, %p70_p0  ;;  %p528_p5 = scmp.ge.s32.totalorder %s816_s17, 1 }
   0xa   : > { %s1075_s20 = scalar_select %p880_p3, 1, 0 }
   0xb   : > { %p887_p6 = por %p880_p3, %p76_p2  ;;  %p139_p7 = scmp.lt.s32.totalorder %s816_s17, 3 }
   0xc   : > { %s818_s23 = smov [#allocation2]   ;;  %p583_p10 = scmp.lt.s32.totalorder %s816_s17, 2 }
   0xd   : > { %s1076_s21 = scalar_select %p887_p6, 1, 0 }
   0xe   : > { %p892_p8 = pnand %p528_p5, %p139_p7  ;;  %s154_s24 = sshll.u32 %s818_s23, 4  ;;  %s155_s24 = int_to_ptr.vmem [resolvable:$true] %s154_s24 }
   0xf   : > { %s165_s25 = sand.u32 1, %s804_s14   ;;  %p906_p12 = pnand %p583_p10, %p72_p4 }
  0x10   : > { %s1077_s22 = scalar_select %p892_p8, 1, 0 }
  0x11   : > { %p574_p9 = pneg %p892_p8  ;;  %s674_s30 = scalar_lea.hbm %s1066_s0, 64 }
  0x12   : > { %s1079_s27 = scalar_select %p906_p12, 1, 0 }
  0x13   : > { %p902_p11 = pnand %p574_p9, %p880_p3  ;;  %p675_p13 = scmp.ne.s32.totalorder %s1066_s0, %s674_s30 }
  0x14   : > { %p681_p5 = scmp.lt.u32.totalorder %s674_s30, %s1066_s0 }
  0x15   : > { %p676_p0 = pneg %p902_p11 }
  0x17   : > { %p677_p1 = pnand %p676_p0, %p675_p13 }
  0x19   : > { %p678_p2 = pneg %p677_p1 }
  0x1b   : > { %p683_p4 = pnand %p681_p5, %p678_p2 }
  0x1d   : > { %686 = shalt.err (!%p683_p4)
}
  0x1e   : > { %s687_s8 = scalar_lea.vmem %s155_s24, 64  ;;  %p695_p6 = scmp.lt.s32.totalorder %s155_s24, %s155_s24 }
  0x1f   : > { %p688_p7 = scmp.ne.s32.totalorder %s155_s24, %s687_s8  ;;  %p696_p3 = scmp.lt.s32.totalorder %s687_s8, %s687_s8 }
  0x21   : > { %p690_p9 = pnand %p688_p7, %p676_p0  ;;  %p697_p8 = por %p696_p3, %p695_p6 }
  0x23   : > { %p691_p10 = pneg %p690_p9 }
  0x25   : > { %p698_p12 = pnand %p697_p8, %p691_p10 }
  0x27   : > { %701 = shalt.err (!%p698_p12)
}
  0x28   : > { %577 = dma.hbm_to_vmem [thread:$0]  (!%p902_p11), %s1066_s0, 64, %s155_s24, [#allocation3]  }
  0x29   : > { %s27_s11 = sadd.s32 1, %s812_s16  ;;  %s531_s12 = sshll.u32 %s165_s25, 7 }
  0x2a   : > { %p28_p13 = scmp.ge.s32.totalorder %s27_s11, 2  ;;  %s563_s23 = sshll.u32 %s812_s16, 11 }
  0x2b   : > { %s169_s28 = scalar_lea.vmem [#allocation5], %s531_s12  ;;  %s935_s4 = scalar_lea.hbm %s1067_s1, %s563_s23 }
  0x2c   : > { %s176_s29 = sshll.u32 %s169_s28, 4  ;;  %s1092_s11 = smov (%p28_p13, %s27_s11), 0  ;;  %s937_s29 = int_to_ptr.vmem [resolvable:$true] %s176_s29 }
  0x2d   : > { %s60_s24 = ssub.s32 %s812_s16, %s1092_s11  ;;  %s947_s6 = scalar_lea.sflag [#allocation6], %s165_s25 }
  0x2e   : > { %p941_p3 = scmp.eq.s32.totalorder %s60_s24, 0  ;;  %s702_s7 = scalar_lea.hbm %s935_s4, 2048 }
  0x2f   : > { %p703_p6 = scmp.ne.s32.totalorder %s935_s4, %s702_s7  ;;  %p1081_p8 = scmp.ne.s32.totalorder %s1079_s27, 0 }
  0x30   : > { %s707_s10 = scalar_lea.hbm %s1067_s1, 4096  ;;  %p708_p1 = scmp.lt.u32.totalorder %s935_s4, %s1067_s1 }
  0x31   : > { %p704_p11 = pneg %p1081_p8  ;;  %p709_p2 = scmp.lt.u32.totalorder %s707_s10, %s702_s7 }
  0x32   : > { %p711_p4 = scmp.lt.u32.totalorder %s702_s7, %s935_s4 }
  0x33   : > { %p705_p12 = pnand %p704_p11, %p703_p6  ;;  %p710_p5 = por %p709_p2, %p708_p1 }
  0x35   : > { %p706_p0 = pneg %p705_p12  ;;  %p712_p7 = por %p711_p4, %p710_p5 }
  0x37   : > { %p713_p9 = pnand %p712_p7, %p706_p0 }
  0x39   : > { %716 = shalt.err (!%p713_p9)
}
  0x3a   : > { %s717_s25 = scalar_lea.vmem %s937_s29, 2048  ;;  %s819_s28 = smov [#allocation5]  }
  0x3b   : > { %p718_p10 = scmp.ne.s32.totalorder %s937_s29, %s717_s25  ;;  %s722_s26 = sshll.u32 %s819_s28, 4  ;;  %s723_s26 = int_to_ptr.vmem [resolvable:$false] %s722_s26 }
  0x3c   : > { %s724_s30 = scalar_lea.vmem %s723_s26, 4096  ;;  %p725_p12 = scmp.lt.s32.totalorder %s937_s29, %s723_s26 }
  0x3d   : > { %p720_p13 = pnand %p718_p10, %p704_p11  ;;  %p726_p1 = scmp.lt.s32.totalorder %s724_s30, %s717_s25 }
  0x3f   : > { %p721_p6 = pneg %p720_p13  ;;  %p727_p2 = por %p726_p1, %p725_p12 }
  0x41   : > { %p728_p5 = pnand %p727_p2, %p721_p6 }
  0x43   : > { %731 = shalt.err (!%p728_p5)
}
  0x44   : > { %s820_s24 = smov 128   ;;  %s821_s7 = smov 8  }
  0x45   : > { %581 = dma.hbm_to_vmem [thread:$0]  (!%p1081_p8), %s935_s4, 2048, %s937_s29, %s947_s6, %s820_s24, %s820_s24, %s821_s7  }
  0x46   : > { %s980_s8 = scalar_select %p941_p3, %s804_s14, %s63_s19  }
  0x47   : > { %p1082_p11 = scmp.ne.s32.totalorder %s1077_s22, 0 }
  0x48   : > { %p1083_p0 = scmp.ne.s32.totalorder (!%p1082_p11), %s1075_s20, 0 }
  0x49   : > { %195 = sbr.rel (%p1082_p11) target bundleno = 1023 (0x3ff), region = 32 }
  0x50   : > { %783 = dma.done.wait (%p1083_p0), [#allocation3], 64  }
  0x51   : > { %785 = vsyncadd (%p1083_p0), [#allocation3], 4294967232  ;;  %s201_s9 = sand.u32 1, %s800_s13   ;;  %p1084_p8 = scmp.ne.s32.totalorder %s1076_s21, 0 }
  0x52   : > { %s536_s10 = sshll.u32 %s201_s9, 7  ;;  %s202_s12 = scalar_lea.sflag [#allocation6], %s201_s9 }
  0x53   : > { %s989_s27 = scalar_lea.vmem [#allocation5], %s536_s10 }
  0x54   : > { %787 = dma.done.wait (%p1084_p8), %s202_s12, 2048  }
  0x55   : > { %789 = vsyncadd (%p1084_p8), %s202_s12, 4294965248  ;;  %v822_v0 = vmov 0   ;;  %v640_v1 = vld [vmem:[%s989_s27 + $0x4] ss:$8 sps:$4 sm:$0xff]   ;;  %v642_v2 = vld [vmem:[%s989_s27] ss:$8 sps:$4 sm:$0xff]   ;;  %v251_v18 = vlaneseq }
  0x56   : > { %373 = vmatprep.mubr.bf16.mxu0 %v822_v0  ;;  %341 = vmatprep.subr.bf16.mxu0 %v640_v1  ;;  %v643_v3 = vld [vmem:[%s989_s27 + $0x14] ss:$8 sps:$4 sm:$0xff]   ;;  %v645_v4 = vld [vmem:[%s989_s27 + $0x10] ss:$8 sps:$4 sm:$0xff]   ;;  %v646_v5 = vld [vmem:[%s989_s27 + $0x24] ss:$8 sps:$4 sm:$0xff]  }
  0x57   : > { %342 = vmatpush1.bf16.msra.mxu0 %v642_v2  ;;  %v648_v6 = vld [vmem:[%s989_s27 + $0x20] ss:$8 sps:$4 sm:$0xff]   ;;  %v649_v7 = vld [vmem:[%s989_s27 + $0x34] ss:$8 sps:$4 sm:$0xff]   ;;  %v651_v8 = vld [vmem:[%s989_s27 + $0x30] ss:$8 sps:$4 sm:$0xff]  }
  0x58   : > { %343 = vmatprep.subr.bf16.mxu0 %v643_v3  ;;  %v652_v9 = vld [vmem:[%s989_s27 + $0x44] ss:$8 sps:$4 sm:$0xff]   ;;  %v654_v10 = vld [vmem:[%s989_s27 + $0x40] ss:$8 sps:$4 sm:$0xff]   ;;  %v655_v11 = vld [vmem:[%s989_s27 + $0x54] ss:$8 sps:$4 sm:$0xff]  }
  0x59   : > { %v657_v12 = vld [vmem:[%s989_s27 + $0x50] ss:$8 sps:$4 sm:$0xff]   ;;  %v658_v13 = vld [vmem:[%s989_s27 + $0x64] ss:$8 sps:$4 sm:$0xff]   ;;  %v660_v14 = vld [vmem:[%s989_s27 + $0x60] ss:$8 sps:$4 sm:$0xff]  }
  0x5a   : > { %v661_v15 = vld [vmem:[%s989_s27 + $0x74] ss:$8 sps:$4 sm:$0xff]   ;;  %v663_v16 = vld [vmem:[%s989_s27 + $0x70] ss:$8 sps:$4 sm:$0xff]   ;;  %p227_p3 = scmp.lt.s32.totalorder %s808_s15, 1  ;;  %v252_v19 = vshrl.u32 %v251_v18, 7 }
  0x5b   : > { %344 = vmatpush1.bf16.msra.mxu0 %v645_v4  ;;  %v232_v17 = vld [vmem:[#allocation2] sm:$0xf]  ;;  %p554_p4 = scmp.ne.s32.totalorder %s808_s15, 0 }
  0x5c   : > { %345 = vmatprep.subr.bf16.mxu0 %v646_v5  ;;  %s228_s19 = scalar_select %p227_p3, %s808_s15, 1  ;;  %v253_v20 = vsub.s32 0, %v252_v19  ;;  %v257_v22 = vsub.s32 1, %v252_v19 }
  0x5e   : > { %s537_s20 = sshll.u32 %s228_s19, 1 }
  0x5f   : > { %346 = vmatpush1.bf16.msra.mxu0 %v648_v6  ;;  %s230_s29 = scalar_lea.vmem %s1068_s2, %s537_s20 }
  0x60   : > { %347 = vmatprep.subr.bf16.mxu0 %v649_v7  ;;  %v249_v21 = vld [vmem:[%s230_s29] sm:$0x3] }
  0x61   : > { %v254_v23 = vrot.slane %v249_v21, %v253_v20  ;;  %v258_v24 = vrot.slane %v249_v21, %v257_v22 }
  0x63   : > { %348 = vmatpush1.bf16.msra.mxu0 %v651_v8 }
  0x64   : > { %349 = vmatprep.subr.bf16.mxu0 %v652_v9 }
  0x67   : > { %350 = vmatpush1.bf16.msra.mxu0 %v654_v10 }
  0x68   : > { %351 = vmatprep.subr.bf16.mxu0 %v655_v11 }
  0x6b   : > { %352 = vmatpush1.bf16.msra.mxu0 %v657_v12 }
  0x6c   : > { %353 = vmatprep.subr.bf16.mxu0 %v658_v13 }
  0x6f   : > { %354 = vmatpush1.bf16.msra.mxu0 %v660_v14 }
  0x70   : > { %355 = vmatprep.subr.bf16.mxu0 %v661_v15 }
  0x73   : > { %356 = vmatpush1.bf16.msra.mxu0 %v663_v16 }
  0x76   : > { %374 = vmatmul.mubr.bf16.vlgmr.msra.gmra.mrb[0].mxu0 %v232_v17 }
 0x149   : > { %v375_v25 = vpop.f32.mrb[0].mxu0 }
 0x14a   : > { %v376_v26 = vadd.f32 %v375_v25, %v254_v23  ;;  %v377_v27 = vpop.f32.mrb[1].mxu0 }
 0x14b   : > { %v378_v28 = vadd.f32 %v377_v27, %v258_v24  ;;  %v379_v29 = vpop.f32.mrb[2].mxu0 }
 0x14c   : > { %v380_v30 = vpop.f32.mrb[3].mxu0  ;;  %382 = vmax.xlane.f32.xlu0 %v376_v26 }
 0x1d9   : > { %v383_v31 = vpop.xlane.xlu0 %382 }
 0x1da   : > { %v384_v32 = vsub.f32 %v376_v26, %v383_v31 }
 0x1dc   : > { %v385_v33 = vmul.f32 1.442695, %v384_v32 }
 0x1de   : > { %664 = vpow2.f32 %v385_v33 }
 0x1e8   : > { %v665_v34 = vpop.eup %664 }
 0x1e9   : > { %387 = vadd.xlane.f32.xlu0 %v665_v34 }
 0x276   : > { %v388_v35 = vpop.xlane.xlu0 %387 }
 0x277   : > { %666 = vrcp.f32 %v388_v35 }
 0x27c   : > { %394 = sbr.rel (%p554_p4) target bundleno = 645 (0x285), region = 44 }
 0x281   : > { %v667_v36 = vpop.eup %666 }
 0x282   : > { %v390_v37 = vmul.f32 %v667_v36, %v665_v34 }
 0x284   : > { %395 = vst [vmem:[#allocation7] sm:$0xff] %v390_v37 }
 0x285 PF: > { %p555_p7 = scmp.eq.s32.totalorder %s808_s15, 0 }
 0x287   : > { %399 = sbr.rel (%p555_p7) target bundleno = 655 (0x28f), region = 48 }
 0x28b   : > { %v400_v38 = vld [vmem:[#allocation7] sm:$0xff] (!%p555_p7) }
 0x28c   : > { %v401_v39 = vadd.f32 (!%p555_p7), %v400_v38, %v390_v37 }
 0x28e   : > { %402 = vst [vmem:[#allocation7] sm:$0xff] %v401_v39 }
 0x28f PF: > { %s556_s4 = sshll.u32 %s808_s15, 1 }
 0x290   : > { %s404_s5 = sadd.s32 1, %s556_s4 }
 0x291   : > { %p557_p9 = scmp.ge.s32.totalorder %s404_s5, 3 }
 0x292   : > { %410 = vmax.xlane.f32.xlu0 (!%p557_p9), %v378_v28 }
 0x293   : > { %408 = sbr.rel (%p557_p9) target bundleno = 973 (0x3cd), region = 52 }
 0x295   : > { %v409_v46 = vld [vmem:[#allocation7] sm:$0xff] (!%p557_p9) }
 0x31f   : > { %v411_v40 = vpop.xlane.xlu0 %410 }
 0x320   : > { %v412_v41 = vsub.f32 %v378_v28, %v411_v40 }
 0x322   : > { %v413_v42 = vmul.f32 1.442695, %v412_v41 }
 0x324   : > { %668 = vpow2.f32 %v413_v42 }
 0x32e   : > { %v669_v43 = vpop.eup %668 }
 0x32f   : > { %415 = vadd.xlane.f32.xlu0 %v669_v43 }
 0x3bc   : > { %v416_v44 = vpop.xlane.xlu0 %415 }
 0x3bd   : > { %670 = vrcp.f32 %v416_v44 }
 0x3c7   : > { %v671_v45 = vpop.eup %670 }
 0x3c8   : > { %v418_v47 = vmul.f32 %v671_v45, %v669_v43 }
 0x3ca   : > { %v419_v48 = vadd.f32 %v418_v47, %v409_v46 }
 0x3cc   : > { %420 = vst [vmem:[#allocation7] sm:$0xff] %v419_v48 }
 0x3cd PF: > { %p558_p10 = scmp.ne.s32.totalorder %s808_s15, 1 }
 0x3cf   : > { %424 = sbr.rel (%p558_p10) target bundleno = 998 (0x3e6), region = 56 }
 0x3d3   : > { %v425_v49 = vld [vmem:[#allocation7] sm:$0xff] (!%p558_p10) }
 0x3d4   : > { %v426_v50 = vmul.f32 (!%p558_p10), 0.33333334, %v425_v49 }
 0x3d6   : > { %v427_v51 = vmax.f32 %v426_v50, 1.1754944e-38 }
 0x3d8   : > { %672 = vlog2.f32 %v427_v51 }
 0x3e2   : > { %v673_v52 = vpop.eup %672 }
 0x3e3   : > { %v429_v53 = vmul.f32 0.6931472, %v673_v52 }
 0x3e5   : > { %430 = vst [vmem:[#allocation7] sm:$0xff] %v429_v53 }
 0x3e6 PF: > { %p1022_p13 = scmp.eq.s32.totalorder %s527_s18, 1  ;;  %s823_s23 = smov [#allocation7]  }
 0x3e7   : > { %s440_s25 = sshll.u32 %s823_s23, 4  ;;  %s441_s25 = int_to_ptr.vmem [resolvable:$true] %s440_s25 }
 0x3e8   : > { %s732_s15 = scalar_lea.vmem %s441_s25, 128  ;;  %p739_p2 = scmp.lt.s32.totalorder %s441_s25, %s441_s25 }
 0x3e9   : > { %p733_p6 = scmp.ne.s32.totalorder %s441_s25, %s732_s15  ;;  %p740_p5 = scmp.lt.s32.totalorder %s732_s15, %s732_s15 }
 0x3eb   : > { %p734_p12 = pnand %p733_p6, %p1022_p13  ;;  %p741_p11 = por %p740_p5, %p739_p2 }
 0x3ed   : > { %p735_p1 = pneg %p734_p12 }
 0x3ef   : > { %p742_p0 = pnand %p741_p11, %p735_p1 }
 0x3f1   : > { %745 = shalt.err (!%p742_p0)
}
 0x3f2   : > { %s746_s18 = scalar_lea.hbm %s1069_s3, 128 }
 0x3f3   : > { %p747_p8 = scmp.ne.s32.totalorder %s1069_s3, %s746_s18  ;;  %p752_p7 = scmp.lt.u32.totalorder %s746_s18, %s1069_s3 }
 0x3f5   : > { %p748_p3 = pnand %p747_p8, %p1022_p13 }
 0x3f7   : > { %p749_p4 = pneg %p748_p3 }
 0x3f9   : > { %p754_p9 = pnand %p752_p7, %p749_p4 }
 0x3fb   : > { %757 = shalt.err (!%p754_p9)
}
 0x3fc   : > { %571 = dma.vmem_to_hbm [thread:$0]  (%p1022_p13), %s441_s25, 128, %s1069_s3, [#allocation4]  }
 0x3fd   : > { %791 = dma.done.wait (%p1022_p13), [#allocation4], 128  }
 0x3fe   : > { %793 = vsyncadd (%p1022_p13), [#allocation4], 4294967168 }
 0x3ff PF: > { %s18_s17 = sadd.s32 1, %s816_s17   ;;  %s1086_s12 = smov %s800_s13 }
 0x400   : > { %p15_p10 = scmp.ge.s32.totalorder %s18_s17, 4   ;;  %s1087_s13 = smov %s804_s14 }
 0x401   : > { %s1088_s14 = smov %s980_s8  ;;  %s1089_s15 = smov %s812_s16 }
 0x402   : > { %s1090_s16 = smov %s1092_s11  ;;  %17 = sbr.rel (!%p15_p10) target bundleno = 6 (0x6), region = 95 }
 0x409   :  { %453 = vsyncpa [#allocation3], 1 }
 0x40a   :  { %455 = vsyncpa [#allocation3 + $0x1], 1 }
 0x40b   :  { %456 = vsyncpa [#allocation6], 1 }
 0x40c   :  { %458 = vsyncpa [#allocation6 + $0x1], 1 }
 0x40d   :  { %459 = vsyncpa [#allocation4], 1 }
 0x40e   :  { %461 = vsyncpa [#allocation4 + $0x1], 1 }

</bundles_post_ra>
